<compile_context>
chip_gen: v5e
topology: v5e:2x2
jax: 0.10.0
libtpu: 0.0.40
codegen_flags: <defaults>
</compile_context>

<pallas_src>
from functools import partial

import jax
import jax.numpy as jnp
from jax import lax
from jax.experimental import pallas as pl
from jax.experimental.pallas import tpu as pltpu


def _round_up(v, m):
    return (v + m - 1) // m * m


def _temporal_block_kernel(xf_ref, mask_ref, w1_ref, w2_ref, wd_ref, o_ref,
                           *, K, dilation, padding):
    """One grid step == one batch tile folded along the lane axis.

    xf_ref:   (C_in,  Wb)       bf16  per-sample chunk = [0^p, x_b (L), 0^(Wc-p-L)]
    mask_ref: (1,     Wb)       f32   1.0 on valid output columns (t < L per chunk)
    w1_ref:   (C_out, K*C_in)   bf16
    w2_ref:   (C_out, K*C_out)  bf16
    wd_ref:   (C_out, C_in)     bf16
    o_ref:    (C_out, Wb)       output dtype
    """
    d, p = dilation, padding
    x = xf_ref[...]                       # (C_in, Wb) bf16
    c_in = x.shape[0]
    c_out = w1_ref.shape[0]
    wb = x.shape[1]

    # ---- conv1: im2col (K causal taps stacked on the contraction axis) + one matmul
    taps1 = []
    for k in range(K):
        s = k * d
        if s == 0:
            taps1.append(x)
        else:
            taps1.append(jnp.concatenate(
                [x[:, s:], jnp.zeros((c_in, s), x.dtype)], axis=1))
    xcol = jnp.concatenate(taps1, axis=0) if K > 1 else taps1[0]      # (K*C_in, Wb)
    h1 = jnp.dot(w1_ref[...], xcol, preferred_element_type=jnp.float32)
    h1 = jnp.maximum(h1, 0.0)             # ReLU (dropout == identity in eval)

    # zero cross-chunk garbage columns so conv2 stays causal across samples,
    # then drop to bf16 for the second MXU pass
    h1b = (h1 * mask_ref[...]).astype(x.dtype)                        # (C_out, Wb)

    # ---- conv2: causal left-extension by p, im2col, one matmul
    if p > 0:
        h1ext = jnp.concatenate(
            [jnp.zeros((c_out, p), x.dtype), h1b], axis=1)            # (C_out, p+Wb)
    else:
        h1ext = h1b
    taps2 = [h1ext[:, k * d: k * d + wb] for k in range(K)]
    hcol = jnp.concatenate(taps2, axis=0) if K > 1 else taps2[0]      # (K*C_out, Wb)
    h2 = jnp.dot(w2_ref[...], hcol, preferred_element_type=jnp.float32)
    h2 = jnp.maximum(h2, 0.0)

    # ---- residual 1x1 downsample conv: taps1[K-1] is x shifted by p == x aligned
    # with the output positions.
    res = jnp.dot(wd_ref[...], taps1[K - 1], preferred_element_type=jnp.float32)

    o_ref[...] = jnp.maximum(h2 + res, 0.0).astype(o_ref.dtype)


def temporal_block(x, w1, w2, wd=None, *, kernel_size, dilation, padding,
                   batch_tile=None):
    """x: (N, C_in, L); w1: (C_out, C_in, K); w2: (C_out, C_out, K);
    wd: (C_out, C_in, 1) or None (identity residual).  Returns (N, C_out, L)."""
    N, C_in, L = x.shape
    C_out = w1.shape[0]
    K, d, p = kernel_size, dilation, padding
    assert p == (K - 1) * d, "TCN causal block requires padding == (K-1)*dilation"

    if wd is None:
        assert C_in == C_out, "identity residual requires C_in == C_out"
        wd = jnp.eye(C_out, dtype=x.dtype)[:, :, None]

    # Per-sample chunk width, padded so the folded lane axis is 128-aligned.
    Wc = _round_up(p + L, 128)
    if batch_tile is None:
        batch_tile = max(1, min(N, 4096 // Wc))        # ~few-thousand-lane slabs
    n_steps = pl.cdiv(N, batch_tile)
    N_pad = n_steps * batch_tile
    Wb = batch_tile * Wc

    # Fold batch into the lane axis: (C_in, N_pad*Wc); bf16 halves HBM->VMEM bytes.
    xpad = jnp.pad(x, ((0, N_pad - N), (0, 0), (p, Wc - p - L)))       # (N_pad, C_in, Wc)
    xf = jnp.transpose(xpad, (1, 0, 2)).reshape(C_in, N_pad * Wc).astype(jnp.bfloat16)

    # Valid-column mask (periodic per chunk -> identical for every grid step).
    mask = jnp.tile((jnp.arange(Wc) < L).astype(jnp.float32),
                    batch_tile).reshape(1, Wb)

    # Weights: (O, I, K) -> (O, K*I), k-major to match the im2col stacking order.
    w1f = jnp.transpose(w1, (0, 2, 1)).reshape(C_out, K * C_in).astype(jnp.bfloat16)
    w2f = jnp.transpose(w2, (0, 2, 1)).reshape(C_out, K * C_out).astype(jnp.bfloat16)
    wdf = wd[:, :, 0].astype(jnp.bfloat16)

    kernel = partial(_temporal_block_kernel, K=K, dilation=d, padding=p)

    flops = 2 * N_pad * Wc * C_out * (K * C_in + K * C_out + C_in)
    bytes_accessed = (xf.size * 2 + C_out * N_pad * Wc * x.dtype.itemsize
                      + (w1f.size + w2f.size + wdf.size) * 2 + mask.size * 4)

    out_folded = pl.pallas_call(
        kernel,
        out_shape=jax.ShapeDtypeStruct((C_out, N_pad * Wc), x.dtype),
        grid_spec=pltpu.PrefetchScalarGridSpec(
            num_scalar_prefetch=0,
            grid=(n_steps,),
            in_specs=[
                pl.BlockSpec((C_in, Wb), lambda n: (0, n)),
                pl.BlockSpec((1, Wb), lambda n: (0, 0)),
                pl.BlockSpec((C_out, K * C_in), lambda n: (0, 0)),
                pl.BlockSpec((C_out, K * C_out), lambda n: (0, 0)),
                pl.BlockSpec((C_out, C_in), lambda n: (0, 0)),
            ],
            out_specs=pl.BlockSpec((C_out, Wb), lambda n: (0, n)),
        ),
        compiler_params=pltpu.CompilerParams(
            dimension_semantics=("parallel",),          # megacore on v7x, no-op on v5e/v6e
            vmem_limit_bytes=32 * 1024 * 1024,          # >= default on v5e, safe on v7x
        ),
        cost_estimate=pl.CostEstimate(
            flops=int(flops), transcendentals=0, bytes_accessed=int(bytes_accessed)),
    )(xf, mask, w1f, w2f, wdf)

    out = out_folded.reshape(C_out, N_pad, Wc)[:, :N, :L]
    return jnp.transpose(out, (1, 0, 2))                # (N, C_out, L)


def _weight_norm(v, g):
    # PyTorch weight_norm(dim=0): w = g * v / ||v||, norm over dims != 0
    norm = jnp.sqrt(jnp.sum(v * v, axis=(1, 2), keepdims=True))
    return g * v / norm


def _ref_causal_conv(x, w, p, d):
    # left-pad-only == pad both sides + Chomp1d
    return lax.conv_general_dilated(
        x, w, window_strides=(1,), padding=[(p, 0)], rhs_dilation=(d,),
        dimension_numbers=("NCH", "OIH", "NCH"),
        precision=lax.Precision.HIGHEST)


if __name__ == "__main__":
    # Shapes consistent with TemporalBlock(n_inputs=4, n_outputs=8,
    # kernel_size=3, stride=1, dilation=1, padding=2)
    N, C_in, C_out, L = 2, 4, 8, 16
    K, dilation = 3, 1
    padding = (K - 1) * dilation

    key = jax.random.PRNGKey(0)
    k_x, k_v1, k_g1, k_v2, k_g2, k_wd = jax.random.split(key, 6)

    x = jax.random.normal(k_x, (N, C_in, L), jnp.float32)

    # weight_norm parametrization for conv1/conv2 (v, g); raw weight for downsample
    v1 = jax.random.normal(k_v1, (C_out, C_in, K), jnp.float32) * 0.3
    g1 = jax.random.normal(k_g1, (C_out, 1, 1), jnp.float32) * 0.5 + 1.0
    v2 = jax.random.normal(k_v2, (C_out, C_out, K), jnp.float32) * 0.3
    g2 = jax.random.normal(k_g2, (C_out, 1, 1), jnp.float32) * 0.5 + 1.0
    wd = jax.random.normal(k_wd, (C_out, C_in, 1), jnp.float32) * 0.3

    w1 = _weight_norm(v1, g1)
    w2 = _weight_norm(v2, g2)

    out = temporal_block(x, w1, w2, wd,
                         kernel_size=K, dilation=dilation, padding=padding)
    out = jax.block_until_ready(out)

    # Pure-JAX reference with the same bf16 operand rounding (f32 accumulation):
    # conv -> chomp -> relu, x2, + 1x1-conv residual, relu.
    bf = lambda a: a.astype(jnp.bfloat16).astype(jnp.float32)
    xb, w1b, w2b, wdb = bf(x), bf(w1), bf(w2), bf(wd)
    h1 = jnp.maximum(_ref_causal_conv(xb, w1b, padding, dilation), 0.0)
    h2 = jnp.maximum(_ref_causal_conv(bf(h1), w2b, padding, dilation), 0.0)
    res = lax.conv_general_dilated(xb, wdb, (1,), [(0, 0)],
                                   dimension_numbers=("NCH", "OIH", "NCH"),
                                   precision=lax.Precision.HIGHEST)
    ref = jnp.maximum(h2 + res, 0.0)

    assert out.shape == (N, C_out, L)
    max_err = jnp.max(jnp.abs(out - ref))
    assert jnp.allclose(out, ref, atol=2e-2, rtol=2e-2), f"mismatch vs reference (max err {max_err})"
    print("KERNEL_OK")
</pallas_src>

<mosaic_0001>
module attributes {stable_mosaic.version = 11 : i64} {
  func.func @_temporal_block_kernel(%arg0: i32, %arg1: memref<4x256xbf16, #tpu.memory_space<vmem>>, %arg2: memref<1x256xf32, #tpu.memory_space<vmem>>, %arg3: memref<8x12xbf16, #tpu.memory_space<vmem>>, %arg4: memref<8x24xbf16, #tpu.memory_space<vmem>>, %arg5: memref<8x4xbf16, #tpu.memory_space<vmem>>, %arg6: memref<8x256xf32, #tpu.memory_space<vmem>>) attributes {dimension_semantics = [#tpu.dimension_semantics<parallel>], iteration_bounds = array<i64: 1>, scalar_prefetch = 0 : i64, scratch_operands = 0 : i64, tpu.core_type = #tpu.core_type<tc>, window_params = [{transform_indices = @transform_0, window_bounds = array<i64: 4, 256>}, {pipeline_mode = #tpu.pipeline_mode<synchronous>, transform_indices = @transform_1, window_bounds = array<i64: 1, 256>}, {pipeline_mode = #tpu.pipeline_mode<synchronous>, transform_indices = @transform_2, window_bounds = array<i64: 8, 12>}, {pipeline_mode = #tpu.pipeline_mode<synchronous>, transform_indices = @transform_3, window_bounds = array<i64: 8, 24>}, {pipeline_mode = #tpu.pipeline_mode<synchronous>, transform_indices = @transform_4, window_bounds = array<i64: 8, 4>}, {transform_indices = @transform_5, window_bounds = array<i64: 8, 256>}]} {
    %c0 = arith.constant 0 : index
    %c0_0 = arith.constant 0 : index
    %0 = vector.load %arg1[%c0, %c0_0] : memref<4x256xbf16, #tpu.memory_space<vmem>>, vector<4x256xbf16>
    %1 = vector.extract_strided_slice %0 {offsets = [0, 1], sizes = [4, 255], strides = [1, 1]} : vector<4x256xbf16> to vector<4x255xbf16>
    %cst = arith.constant 0.000000e+00 : bf16
    %2 = vector.broadcast %cst : bf16 to vector<4x1xbf16>
    %3 = tpu.concatenate %1, %2 in 1 : vector<4x255xbf16>, vector<4x1xbf16> -> vector<4x256xbf16>
    %4 = vector.extract_strided_slice %0 {offsets = [0, 2], sizes = [4, 254], strides = [1, 1]} : vector<4x256xbf16> to vector<4x254xbf16>
    %cst_1 = arith.constant 0.000000e+00 : bf16
    %5 = vector.broadcast %cst_1 : bf16 to vector<4x2xbf16>
    %6 = tpu.concatenate %4, %5 in 1 : vector<4x254xbf16>, vector<4x2xbf16> -> vector<4x256xbf16>
    %7 = tpu.concatenate %0, %3, %6 in 0 : vector<4x256xbf16>, vector<4x256xbf16>, vector<4x256xbf16> -> vector<12x256xbf16>
    %c0_2 = arith.constant 0 : index
    %c0_3 = arith.constant 0 : index
    %8 = vector.load %arg3[%c0_2, %c0_3] : memref<8x12xbf16, #tpu.memory_space<vmem>>, vector<8x12xbf16>
    %cst_4 = arith.constant dense<0.000000e+00> : vector<8x256xf32>
    %9 = tpu.matmul %8, %7, %cst_4 {dimension_numbers = #tpu.dot_dimension_numbers<[1], [0], [0], [1], [0, 0, 1, 1], [], []>} : vector<8x12xbf16>, vector<12x256xbf16>, vector<8x256xf32> -> vector<8x256xf32>
    %cst_5 = arith.constant 0.000000e+00 : f32
    %10 = vector.broadcast %cst_5 : f32 to vector<8x256xf32>
    %11 = arith.maximumf %9, %10 : vector<8x256xf32>
    %c0_6 = arith.constant 0 : index
    %c0_7 = arith.constant 0 : index
    %12 = vector.load %arg2[%c0_6, %c0_7] : memref<1x256xf32, #tpu.memory_space<vmem>>, vector<1x256xf32>
    %13 = vector.broadcast %12 : vector<1x256xf32> to vector<8x256xf32>
    %14 = arith.mulf %11, %13 : vector<8x256xf32>
    %15 = arith.truncf %14 : vector<8x256xf32> to vector<8x256xbf16>
    %cst_8 = arith.constant 0.000000e+00 : bf16
    %16 = vector.broadcast %cst_8 : bf16 to vector<8x2xbf16>
    %17 = tpu.concatenate %16, %15 in 1 : vector<8x2xbf16>, vector<8x256xbf16> -> vector<8x258xbf16>
    %18 = vector.extract_strided_slice %17 {offsets = [0, 0], sizes = [8, 256], strides = [1, 1]} : vector<8x258xbf16> to vector<8x256xbf16>
    %19 = vector.extract_strided_slice %17 {offsets = [0, 1], sizes = [8, 256], strides = [1, 1]} : vector<8x258xbf16> to vector<8x256xbf16>
    %20 = vector.extract_strided_slice %17 {offsets = [0, 2], sizes = [8, 256], strides = [1, 1]} : vector<8x258xbf16> to vector<8x256xbf16>
    %21 = tpu.concatenate %18, %19, %20 in 0 : vector<8x256xbf16>, vector<8x256xbf16>, vector<8x256xbf16> -> vector<24x256xbf16>
    %c0_9 = arith.constant 0 : index
    %c0_10 = arith.constant 0 : index
    %22 = vector.load %arg4[%c0_9, %c0_10] : memref<8x24xbf16, #tpu.memory_space<vmem>>, vector<8x24xbf16>
    %cst_11 = arith.constant dense<0.000000e+00> : vector<8x256xf32>
    %23 = tpu.matmul %22, %21, %cst_11 {dimension_numbers = #tpu.dot_dimension_numbers<[1], [0], [0], [1], [0, 0, 1, 1], [], []>} : vector<8x24xbf16>, vector<24x256xbf16>, vector<8x256xf32> -> vector<8x256xf32>
    %cst_12 = arith.constant 0.000000e+00 : f32
    %24 = vector.broadcast %cst_12 : f32 to vector<8x256xf32>
    %25 = arith.maximumf %23, %24 : vector<8x256xf32>
    %c0_13 = arith.constant 0 : index
    %c0_14 = arith.constant 0 : index
    %26 = vector.load %arg5[%c0_13, %c0_14] : memref<8x4xbf16, #tpu.memory_space<vmem>>, vector<8x4xbf16>
    %cst_15 = arith.constant dense<0.000000e+00> : vector<8x256xf32>
    %27 = tpu.matmul %26, %6, %cst_15 {dimension_numbers = #tpu.dot_dimension_numbers<[1], [0], [0], [1], [0, 0, 1, 1], [], []>} : vector<8x4xbf16>, vector<4x256xbf16>, vector<8x256xf32> -> vector<8x256xf32>
    %28 = arith.addf %25, %27 : vector<8x256xf32>
    %cst_16 = arith.constant 0.000000e+00 : f32
    %29 = vector.broadcast %cst_16 : f32 to vector<8x256xf32>
    %30 = arith.maximumf %28, %29 : vector<8x256xf32>
    %c0_17 = arith.constant 0 : index
    %c0_18 = arith.constant 0 : index
    %31 = vector.load %arg6[%c0_17, %c0_18] : memref<8x256xf32, #tpu.memory_space<vmem>>, vector<8x256xf32>
    tpu.vector_store %arg6[%c0_17, %c0_18], %30 {strides = array<i32>} : memref<8x256xf32, #tpu.memory_space<vmem>>, vector<8x256xf32>,
    return
  }
  func.func @transform_0(%arg0: i32) -> (i32, i32) {
    %c0_i32 = arith.constant 0 : i32
    %c0_i32_0 = arith.constant 0 : i32
    return %c0_i32, %arg0 : i32, i32
  }
  func.func @transform_1(%arg0: i32) -> (i32, i32) {
    %c0_i32 = arith.constant 0 : i32
    %c0_i32_0 = arith.constant 0 : i32
    %c0_i32_1 = arith.constant 0 : i32
    return %c0_i32, %c0_i32_0 : i32, i32
  }
  func.func @transform_2(%arg0: i32) -> (i32, i32) {
    %c0_i32 = arith.constant 0 : i32
    %c0_i32_0 = arith.constant 0 : i32
    %c0_i32_1 = arith.constant 0 : i32
    return %c0_i32, %c0_i32_0 : i32, i32
  }
  func.func @transform_3(%arg0: i32) -> (i32, i32) {
    %c0_i32 = arith.constant 0 : i32
    %c0_i32_0 = arith.constant 0 : i32
    %c0_i32_1 = arith.constant 0 : i32
    return %c0_i32, %c0_i32_0 : i32, i32
  }
  func.func @transform_4(%arg0: i32) -> (i32, i32) {
    %c0_i32 = arith.constant 0 : i32
    %c0_i32_0 = arith.constant 0 : i32
    %c0_i32_1 = arith.constant 0 : i32
    return %c0_i32, %c0_i32_0 : i32, i32
  }
  func.func @transform_5(%arg0: i32) -> (i32, i32) {
    %c0_i32 = arith.constant 0 : i32
    %c0_i32_0 = arith.constant 0 : i32
    return %c0_i32, %arg0 : i32, i32
  }
}

</mosaic_0001>

<bundles_post_ra>
// kernel: tpu_custom_call.1
= control target key start
LH: loop header
LB: loop body
LE: loop exit
PB: predicated region body
PF: predicated region fallthrough
CT: control target
= control target key end

     0   :  { %10 = vsyncpa [#allocation3], 0  ;;  %s459_s0 = inlined_call_operand.vmem [shape: bf16[4,256], index: 0, kind: input, shape index: {}]   ;;  %s460_s1 = inlined_call_operand.hbm [shape: f32[1,256], index: 1, kind: input, shape index: {}]   ;;  %s461_s2 = inlined_call_operand.hbm [shape: bf16[8,12], index: 2, kind: input, shape index: {}]   ;;  %s462_s3 = inlined_call_operand.vmem [shape: bf16[8,24], index: 3, kind: input, shape index: {}]   ;;  %s463_s4 = inlined_call_operand.vmem [shape: bf16[8,4], index: 4, kind: input, shape index: {}]   ;;  %s464_s5 = inlined_call_operand.hbm [shape: f32[8,256], index: 5, kind: output, shape index: {}]  }
   0x1   :  { %11 = vsyncpa [#allocation6], 0 }
   0x2   :  { %12 = vsyncpa [#allocation4], 0  ;;  %s20_s20 = sshll.u32 %s460_s1, 4  ;;  %s377_s21 = smov [#allocation2]   ;;  %s21_s20 = int_to_ptr.hbm [resolvable:$true] %s20_s20 }
   0x3   :  { %s22_s22 = sshll.u32 %s377_s21, 4  ;;  %s31_s25 = sshll.u32 %s461_s2, 4  ;;  %s23_s22 = int_to_ptr.vmem [resolvable:$true] %s22_s22  ;;  %s32_s25 = int_to_ptr.hbm [resolvable:$true] %s31_s25 }
   0x4   :  { %25 = dma.hbm_to_vmem [thread:$0]  %s21_s20, 32, %s23_s22, [#allocation3]  }
   0x5   :  { %s378_s26 = smov [#allocation5]  }
   0x6   :  { %s33_s27 = sshll.u32 %s378_s26, 4  ;;  %s34_s27 = int_to_ptr.vmem [resolvable:$true] %s33_s27 }
   0x7   :  { %36 = dma.hbm_to_vmem [thread:$0]  %s32_s25, 64, %s34_s27, [#allocation6]  }
   0x8   :  { %371 = dma.done.wait [#allocation3], 32  }
   0x9   :  { %372 = vsyncadd [#allocation3], 4294967264 }
   0xa   :  { %373 = dma.done.wait [#allocation6], 64  }
   0xb   :  { %374 = vsyncadd [#allocation6], 4294967232  ;;  %v50_v0 = vld [vmem:[%s459_s0] sm:$0xf]  ;;  %s379_s29 = smov 127   ;;  %s380_s2 = smov 126  }
   0xc   :  { %52 = vst [vmem:[#allocation1] ss:$4 sm:$0xff] %v50_v0  ;;  %vm61_vm0 = vcmask 1039360   ;;  %vm76_vm1 = vcmask 1031168   ;;  %vm90_vm2 = vcmask 1041408   ;;  %vm95_vm3 = vcmask 1043456  }
   0xd   :  { %vm105_vm4 = vcmask 1045504   ;;  %v100_v27 = vld [vmem:[#allocation5] sm:$0xf]  ;;  %vm101_vm5 = vcmask 97280   ;;  %v138_v28 = vld [vmem:[#allocation2] sm:$0x3] }
   0xe   :  { %v140_v29 = vperm.slane %v138_v28, 0  ;;  %v141_v30 = vperm.slane %v138_v28, 1  ;;  %s381_s0 = smov 2   ;;  %vm156_vm6 = vcmask 15360   ;;  %v227_v51 = vld [vmem:[%s463_s4] sm:$0xf] }
   0xf   :  { %vm228_vm7 = vcmask 31744   ;;  %vm189_vm8 = vcmask 195584   ;;  %s382_s8 = smov [#allocation7]   ;;  %s276_s12 = sshll.u32 %s464_s5, 4  ;;  %s277_s12 = int_to_ptr.hbm [resolvable:$true] %s276_s12 }
  0x10   :  { %s274_s9 = sshll.u32 %s382_s8, 4  ;;  %s275_s9 = int_to_ptr.vmem [resolvable:$true] %s274_s9 }
  0x13   :  { %v53_v1 = vld.sshfl [vmem:[#allocation1] sm:$0xff pattern:$0x73625140]  ;;  %v55_v2 = vld.sshfl [vmem:[#allocation1 + $0x8] sm:$0xff pattern:$0x73625140] }
  0x14   :  { %57 = vrot.lane.b32.xlu0 %v53_v1, %s379_s29  ;;  %67 = vst [vmem:[#allocation1] ss:$4 sm:$0xff] %v50_v0 }
  0x1b   :  { %v68_v3 = vld.sshfl [vmem:[#allocation1] sm:$0xff pattern:$0x73625140]  ;;  %v70_v4 = vld.sshfl [vmem:[#allocation1 + $0x8] sm:$0xff pattern:$0x73625140] }
  0x1c   :  { %59 = vrot.lane.b32.xlu0 %v55_v2, %s379_s29  ;;  %72 = vrot.lane.b32.xlu1 %v68_v3, %s380_s2  ;;  %81 = vst [vmem:[#allocation1] ss:$4 sm:$0xff] %v50_v0  ;;  %v188_v2 = vld [vmem:[%s462_s3] sm:$0xf] }
  0x23   :  { %v83_v11 = vld.sshfl [vmem:[#allocation1 + $0x8] sm:$0xff pattern:$0x73625140]  ;;  %v82_v14 = vld.sshfl [vmem:[#allocation1] sm:$0xff pattern:$0x73625140] }
  0x24   :  { %74 = vrot.lane.b32.xlu1 %v70_v4, %s380_s2 }
  0x86   :  { %v58_v5 = vpop.permute.xlu0 %57 }
  0x8e   :  { %v73_v6 = vpop.permute.xlu1 %72  ;;  %v60_v7 = vpop.permute.xlu0 %59 }
  0x8f   :  { %v66_v8 = vsel %vm61_vm0, %v60_v7, 0  ;;  %v62_v9 = vsel %vm61_vm0, %v58_v5, %v60_v7 }
  0x90   :  { %v86_v10 = vrot.slane %v66_v8, 6  ;;  %v85_v12 = vrot.slane %v62_v9, 6 }
  0x92   :  { %v94_v17 = vsel %vm90_vm2, %v83_v11, %v86_v10  ;;  %v92_v20 = vsel %vm90_vm2, %v82_v14, %v85_v12 }
  0x96   :  { %v75_v13 = vpop.permute.xlu1 %74 }
  0x97   :  { %v77_v15 = vsel %vm76_vm1, %v73_v6, %v75_v13  ;;  %v80_v16 = vsel %vm76_vm1, %v75_v13, 0 }
  0x98   :  { %v88_v18 = vrot.slane %v77_v15, 4  ;;  %v89_v19 = vrot.slane %v80_v16, 4  ;;  %v233_v25 = vsel %vm90_vm2, %v77_v15, 0  ;;  %v235_v26 = vsel %vm90_vm2, %v80_v16, 0 }
  0x9a   :  { %v97_v21 = vsel %vm95_vm3, %v92_v20, %v88_v18  ;;  %v99_v22 = vsel %vm95_vm3, %v94_v17, %v89_v19 }
  0x9b   :  { %v106_v23 = vsel %vm105_vm4, %v97_v21, 0  ;;  %v108_v24 = vsel %vm105_vm4, %v99_v22, 0 }
  0x9c   :  { %117 = vmatpush.bf16.msra.mxu0 %v106_v23  ;;  %130 = vmatpush.bf16.msra.mxu1 %v108_v24 }
  0x9f   :  { %287 = vmatmul.msk.bf16.vlgmr.msra.gmra.mxu0 %vm101_vm5, %v100_v27  ;;  %288 = vmatmul.msk.bf16.vlgmr.msra.gmra.mxu1 %vm101_vm5, %v100_v27 }
  0xa0   :  { %244 = vmatpush.bf16.msrb.mxu0 %v233_v25  ;;  %257 = vmatpush.bf16.msrb.mxu1 %v235_v26 }
  0xaf   :  { %291 = vmatmul.msk.bf16.vlgmr.msrb.gmra.mxu0 %vm228_vm7, %v227_v51  ;;  %292 = vmatmul.msk.bf16.vlgmr.msrb.gmra.mxu1 %vm228_vm7, %v227_v51 }
 0x11c   :  { %v119_v31 = vpop.f32.mrf.mxu0  ;;  %v132_v32 = vpop.f32.mrf.mxu1 }
 0x11d   :  { %v136_v33 = vmax.f32 %v119_v31, 0.0  ;;  %v137_v34 = vmax.f32 %v132_v32, 0.0 }
 0x11f   :  { %v144_v35 = vmul.f32 %v140_v29, %v136_v33  ;;  %v145_v36 = vmul.f32 %v141_v30, %v137_v34 }
 0x121   :  { %v146_v37 = vpack.c.bf16 %v145_v36, %v144_v35 }
 0x123   :  { %v148_v38 = vunpack.c.l.b16 %v146_v37  ;;  %v149_v42 = vunpack.c.h.b16 %v146_v37 }
 0x124   :  { %v121_v39 = vpop.f32.mrf.mxu0  ;;  %v134_v40 = vpop.f32.mrf.mxu1 }
 0x125   :  { %v150_v41 = vpack.c.b16 %v148_v38, %v148_v38  ;;  %v151_v43 = vpack.c.b16 %v149_v42, %v149_v42 }
 0x127   :  { %152 = vrot.lane.b32.xlu2 %v150_v41, %s381_s0 }
 0x12c   :  { %v246_v3 = vpop.f32.mrf.mxu0  ;;  %v259_v4 = vpop.f32.mrf.mxu1 }
 0x12f   :  { %154 = vrot.lane.b32.xlu2 %v151_v43, %s381_s0 }
 0x134   :  { %v248_v5 = vpop.f32.mrf.mxu0  ;;  %v261_v6 = vpop.f32.mrf.mxu1 }
 0x181   :  { %v153_v44 = vpop.permute.xlu2 %152 }
 0x182   :  { %v160_v45 = vsel %vm156_vm6, 0, %v153_v44 }
 0x183   :  { %173 = vrot.lane.b32.xlu0 %v160_v45, %s380_s2  ;;  %v162_v47 = vrot.slane %v160_v45, 4 }
 0x189   :  { %v155_v46 = vpop.permute.xlu2 %154 }
 0x18a   :  { %177 = vrot.lane.b32.xlu2 %v155_v46, %s380_s2  ;;  %v157_v48 = vsel %vm156_vm6, %v153_v44, %v155_v46  ;;  %v164_v49 = vrot.slane %v155_v46, 4 }
 0x18b   :  { %165 = vrot.lane.b32.xlu0 %v162_v47, %s379_s29  ;;  %175 = vrot.lane.b32.xlu1 %v157_v48, %s380_s2  ;;  %v163_v50 = vrot.slane %v157_v48, 4 }
 0x192   :  { %169 = vrot.lane.b32.xlu2 %v164_v49, %s379_s29 }
 0x193   :  { %167 = vrot.lane.b32.xlu1 %v163_v50, %s379_s29 }
 0x1e4   :  { %v178_v52 = vpop.permute.xlu2 %177 }
 0x1ec   :  { %v170_v59 = vpop.permute.xlu2 %169 }
 0x1f5   :  { %v174_v53 = vpop.permute.xlu0 %173 }
 0x1fd   :  { %v176_v54 = vpop.permute.xlu1 %175  ;;  %v166_v60 = vpop.permute.xlu0 %165 }
 0x1fe   :  { %v179_v55 = vsel %vm76_vm1, %v174_v53, %v176_v54  ;;  %v180_v56 = vsel %vm76_vm1, %v176_v54, %v178_v52 }
 0x1ff   :  { %v194_v57 = vsel %vm95_vm3, %v179_v55, 0  ;;  %v197_v58 = vsel %vm95_vm3, %v180_v56, 0 }
 0x200   :  { %205 = vmatpush.bf16.msra.mxu2 %v194_v57  ;;  %218 = vmatpush.bf16.msra.mxu3 %v197_v58 }
 0x205   :  { %v168_v61 = vpop.permute.xlu1 %167 }
 0x206   :  { %v171_v62 = vsel %vm61_vm0, %v166_v60, %v168_v61  ;;  %v172_v63 = vsel %vm61_vm0, %v168_v61, %v170_v59 }
 0x207   :  { %v182_v0 = vsel %vm95_vm3, %v160_v45, %v171_v62  ;;  %v186_v1 = vsel %vm95_vm3, %v157_v48, %v172_v63 }
 0x208   :  { %206 = vmatpush.bf16.msra.mxu2 %v182_v0  ;;  %219 = vmatpush.bf16.msra.mxu3 %v186_v1 }
 0x20b   :  { %289 = vmatmul.msk.bf16.vlgmr.msra.gmra.mxu2 %vm189_vm8, %v188_v2  ;;  %290 = vmatmul.msk.bf16.vlgmr.msra.gmra.mxu3 %vm189_vm8, %v188_v2 }
 0x28e   :  { %v208_v7 = vpop.f32.mrf.mxu2  ;;  %v221_v8 = vpop.f32.mrf.mxu3 }
 0x28f   :  { %v225_v9 = vmax.f32 %v208_v7, 0.0  ;;  %v226_v10 = vmax.f32 %v221_v8, 0.0 }
 0x291   :  { %v263_v11 = vadd.f32 %v246_v3, %v225_v9  ;;  %v264_v12 = vadd.f32 %v259_v4, %v226_v10 }
 0x293   :  { %v265_v13 = vmax.f32 %v263_v11, 0.0  ;;  %v266_v14 = vmax.f32 %v264_v12, 0.0 }
 0x295   :  { %267 = vst [vmem:[#allocation7] sm:$0xff] %v265_v13 }
 0x296   :  { %268 = vst [vmem:[#allocation7 + $0x8] sm:$0xff] %v266_v14  ;;  %v210_v15 = vpop.f32.mrf.mxu2  ;;  %v223_v16 = vpop.f32.mrf.mxu3 }
 0x297   :  { %279 = dma.vmem_to_hbm [thread:$0]  %s275_s9, 256, %s277_s12, [#allocation4]  }
 0x298   :  { %375 = dma.done.wait [#allocation4], 256  }
 0x299   :  { %376 = vsyncadd [#allocation4], 4294967040 }
 0x29a   :  { %284 = vsyncpa [#allocation3], 1 }
 0x29b   :  { %285 = vsyncpa [#allocation6], 1 }
 0x29c   :  { %286 = vsyncpa [#allocation4], 1 }

</bundles_post_ra>
